<compile_context>
chip_gen: v6e
topology: v6e:2x2x1
jax: 0.10.0
libtpu: 0.0.40
codegen_flags: <defaults>
</compile_context>

<pallas_src>
import functools

import jax
import jax.numpy as jnp
from jax import lax
from jax.experimental import pallas as pl
from jax.experimental.pallas import tpu as pltpu

# A @ B^T with both operands 2-D ("NT" matmul, flash-attention style).
_NT_DIMS = (((1,), (1,)), ((), ()))


def dynamics_mlp_kernel(x_ref, w0_ref, b0_ref, w1_ref, b1_ref, wo_ref, bo_ref,
                        o_ref, *, chunk, n_chunks):
    """Fused 3-matmul MLP over one batch-major block.

    x_ref : (tm, input_dim)              batch-major activation tile
    w*_ref: PyTorch (out_features, in_features) layout -> y = act @ W^T + b
    b*_ref: (1, out_features) float32    (sublane-broadcast over the batch rows)
    o_ref : (tm, output_dim)             batch-major output tile
    """

    def compute(start):
        # (chunk, input_dim); cast to the weight dtype (bf16 by default) in-kernel.
        xc = x_ref[pl.ds(start, chunk), :].astype(w0_ref.dtype)

        # (input_layer folded into h0) + ReLU   -> (chunk, n_neurons)
        h = lax.dot_general(xc, w0_ref[...], _NT_DIMS,
                            preferred_element_type=jnp.float32)
        h = jnp.maximum(h + b0_ref[...], 0.0)

        # h1 + ReLU                              -> (chunk, n_neurons)
        h = lax.dot_general(h.astype(w1_ref.dtype), w1_ref[...], _NT_DIMS,
                            preferred_element_type=jnp.float32)
        h = jnp.maximum(h + b1_ref[...], 0.0)

        # output_layer (no activation)           -> (chunk, output_dim)
        out = lax.dot_general(h.astype(wo_ref.dtype), wo_ref[...], _NT_DIMS,
                              preferred_element_type=jnp.float32)
        out = out + bo_ref[...]
        o_ref[pl.ds(start, chunk), :] = out.astype(o_ref.dtype)

    if n_chunks == 1:
        compute(0)
    else:
        def body(j, carry):
            compute(pl.multiple_of(j * chunk, chunk))
            return carry
        # Unroll short chunk loops so the LLO scheduler can overlap the MXU pushes of
        # chunk i with the VPU ReLU/cast of chunk i-1; keep long ones rolled.
        lax.fori_loop(0, n_chunks, body, 0, unroll=n_chunks <= 8)


def dynamics_net_forward(x, params, *, tm=8192, chunk=256,
                         compute_dtype=jnp.bfloat16):
    """x: (B, input_dim). params: PyTorch-layout weights (out, in) and biases (out,).

    Returns (B, output_dim), matching DynamicsNet.forward.
    """
    B, input_dim = x.shape
    n_neurons = params["w_h1"].shape[0]
    output_dim = params["w_out"].shape[0]

    # ---- wrapper-side algebra (exact: no activation between input_layer and h0) ----
    w_fold = params["w_h0"] @ params["w_in"]                       # (n_neurons, input_dim)
    b_fold = params["w_h0"] @ params["b_in"] + params["b_h0"]      # (n_neurons,)

    # Matmul operands in compute_dtype (bf16 default -> MXU native on v5e/v6e/v7x);
    # biases stay f32 (accumulation is f32 via preferred_element_type).
    w0 = w_fold.astype(compute_dtype)                              # (n_neurons, input_dim)
    w1 = params["w_h1"].astype(compute_dtype)                      # (n_neurons, n_neurons)
    wo = params["w_out"].astype(compute_dtype)                     # (output_dim, n_neurons)
    b0 = b_fold.reshape(1, n_neurons).astype(jnp.float32)
    b1 = params["b_h1"].reshape(1, n_neurons).astype(jnp.float32)
    bo = params["b_out"].reshape(1, output_dim).astype(jnp.float32)

    # ---- batch tile / chunk selection -------------------------------------------
    # Large tiles amortize the ~0.35 us per-grid-step pipeline overhead; capping at
    # ceil(B/2) keeps >=2 grid steps when possible so the "parallel" batch axis can
    # shard across both v7x TensorCores.  The kernel processes the tile in `chunk`
    # row sub-tiles to bound vreg pressure.
    if B <= chunk:
        tm_eff, chunk_eff = B, B       # single step / single chunk; full-dim block
    else:
        half = pl.cdiv(B, 2)
        tm_eff = max(chunk, (min(tm, half) // chunk) * chunk)
        chunk_eff = chunk
    n_chunks = tm_eff // chunk_eff
    grid = (pl.cdiv(B, tm_eff),)

    # Explicit scoped-VMEM limit only if the tile choice could exceed v5e's 16 MiB
    # default (never hit at the default tm; weights total <10 KiB).
    in_bytes = jnp.dtype(x.dtype).itemsize
    vmem_est = 2 * tm_eff * (input_dim + output_dim) * in_bytes + (1 << 20)
    vmem_limit = int(min(vmem_est + (8 << 20), 64 << 20)) if vmem_est > (12 << 20) else None

    kernel = functools.partial(dynamics_mlp_kernel,
                               chunk=chunk_eff, n_chunks=n_chunks)

    full = lambda shape: pl.BlockSpec(shape, lambda i: (0, 0))

    out = pl.pallas_call(
        kernel,
        out_shape=jax.ShapeDtypeStruct((B, output_dim), x.dtype),
        grid_spec=pltpu.PrefetchScalarGridSpec(
            num_scalar_prefetch=0,
            grid=grid,
            in_specs=[
                pl.BlockSpec((tm_eff, input_dim), lambda i: (i, 0)),  # x (batch-major)
                full((n_neurons, input_dim)),                         # folded input+h0 weight
                full((1, n_neurons)),                                 # folded bias
                full((n_neurons, n_neurons)),                         # w_h1
                full((1, n_neurons)),                                 # b_h1
                full((output_dim, n_neurons)),                        # w_out
                full((1, output_dim)),                                # b_out
            ],
            out_specs=pl.BlockSpec((tm_eff, output_dim), lambda i: (i, 0)),
        ),
        compiler_params=pltpu.CompilerParams(
            dimension_semantics=("parallel",),     # batch axis shards across TCs on v7x
            vmem_limit_bytes=vmem_limit),
    )(x, w0, b0, w1, b1, wo, bo)

    return out                                                       # (B, output_dim)


def init_params(key, input_dim, output_dim, n_neurons):
    """Deterministic synthetic init in PyTorch nn.Linear layout: W (out, in), b (out,)."""
    ks = jax.random.split(key, 8)
    s = 0.1
    return {
        "w_in": s * jax.random.normal(ks[0], (n_neurons, input_dim), jnp.float32),
        "b_in": s * jax.random.normal(ks[1], (n_neurons,), jnp.float32),
        "w_h0": s * jax.random.normal(ks[2], (n_neurons, n_neurons), jnp.float32),
        "b_h0": s * jax.random.normal(ks[3], (n_neurons,), jnp.float32),
        "w_h1": s * jax.random.normal(ks[4], (n_neurons, n_neurons), jnp.float32),
        "b_h1": s * jax.random.normal(ks[5], (n_neurons,), jnp.float32),
        "w_out": s * jax.random.normal(ks[6], (output_dim, n_neurons), jnp.float32),
        "b_out": s * jax.random.normal(ks[7], (output_dim,), jnp.float32),
    }


def reference_forward(x, p):
    """Pure-JAX mirror of DynamicsNet.forward (batch-major, PyTorch weight layout)."""
    h = x @ p["w_in"].T + p["b_in"]
    h = jnp.maximum(h @ p["w_h0"].T + p["b_h0"], 0.0)
    h = jnp.maximum(h @ p["w_h1"].T + p["b_h1"], 0.0)
    return h @ p["w_out"].T + p["b_out"]


if __name__ == "__main__":
    # Small shapes consistent with DynamicsNet(input_dim, output_dim, n_neurons, nn.ReLU)
    batch, input_dim, output_dim, n_neurons = 8, 16, 8, 32

    key = jax.random.PRNGKey(0)
    k_x, k_p, k_x2 = jax.random.split(key, 3)
    x = jax.random.normal(k_x, (batch, input_dim), jnp.float32)
    params = init_params(k_p, input_dim, output_dim, n_neurons)
    ref = reference_forward(x, params)

    # f32-operand path (exact up to fold-reassociation / MXU rounding)
    out_f32 = jax.block_until_ready(
        dynamics_net_forward(x, params, compute_dtype=jnp.float32))
    assert out_f32.shape == (batch, output_dim)
    assert jnp.allclose(out_f32, ref, atol=1e-3, rtol=1e-3), "f32 kernel mismatch vs reference"

    # default path: bf16 operands, f32 accumulation — looser tolerance.
    out_bf16 = jax.block_until_ready(dynamics_net_forward(x, params))
    assert out_bf16.shape == (batch, output_dim)
    assert bool(jnp.all(jnp.isfinite(out_bf16)))
    assert jnp.allclose(out_bf16, ref, atol=1e-1, rtol=1e-1), "bf16 kernel far from reference"

    # Moderate batch: exercises the multi-step grid, the in-kernel chunk loop and a
    # partial (masked) tail block — the actual performance path.
    B2 = 2176
    x2 = jax.random.normal(k_x2, (B2, input_dim), jnp.float32)
    ref2 = reference_forward(x2, params)
    out2 = jax.block_until_ready(
        dynamics_net_forward(x2, params, compute_dtype=jnp.float32))
    assert out2.shape == (B2, output_dim)
    assert jnp.allclose(out2, ref2, atol=1e-3, rtol=1e-3), "tiled kernel mismatch vs reference"

    print("KERNEL_OK")
</pallas_src>

<mosaic_0001>
module attributes {stable_mosaic.version = 11 : i64} {
  func.func @dynamics_mlp_kernel(%arg0: i32, %arg1: memref<8x16xf32, #tpu.memory_space<vmem>>, %arg2: memref<32x16xf32, #tpu.memory_space<vmem>>, %arg3: memref<1x32xf32, #tpu.memory_space<vmem>>, %arg4: memref<32x32xf32, #tpu.memory_space<vmem>>, %arg5: memref<1x32xf32, #tpu.memory_space<vmem>>, %arg6: memref<8x32xf32, #tpu.memory_space<vmem>>, %arg7: memref<1x8xf32, #tpu.memory_space<vmem>>, %arg8: memref<8x8xf32, #tpu.memory_space<vmem>>) attributes {dimension_semantics = [#tpu.dimension_semantics<parallel>], iteration_bounds = array<i64: 1>, scalar_prefetch = 0 : i64, scratch_operands = 0 : i64, tpu.core_type = #tpu.core_type<tc>, window_params = [{transform_indices = @transform_0, window_bounds = array<i64: 8, 16>}, {pipeline_mode = #tpu.pipeline_mode<synchronous>, transform_indices = @transform_1, window_bounds = array<i64: 32, 16>}, {pipeline_mode = #tpu.pipeline_mode<synchronous>, transform_indices = @transform_2, window_bounds = array<i64: 1, 32>}, {pipeline_mode = #tpu.pipeline_mode<synchronous>, transform_indices = @transform_3, window_bounds = array<i64: 32, 32>}, {pipeline_mode = #tpu.pipeline_mode<synchronous>, transform_indices = @transform_4, window_bounds = array<i64: 1, 32>}, {pipeline_mode = #tpu.pipeline_mode<synchronous>, transform_indices = @transform_5, window_bounds = array<i64: 8, 32>}, {pipeline_mode = #tpu.pipeline_mode<synchronous>, transform_indices = @transform_6, window_bounds = array<i64: 1, 8>}, {transform_indices = @transform_7, window_bounds = array<i64: 8, 8>}]} {
    %c0 = arith.constant 0 : index
    %c0_0 = arith.constant 0 : index
    %0 = vector.load %arg1[%c0, %c0_0] : memref<8x16xf32, #tpu.memory_space<vmem>>, vector<8x16xf32>
    %c0_1 = arith.constant 0 : index
    %c0_2 = arith.constant 0 : index
    %1 = vector.load %arg2[%c0_1, %c0_2] : memref<32x16xf32, #tpu.memory_space<vmem>>, vector<32x16xf32>
    %cst = arith.constant dense<0.000000e+00> : vector<8x32xf32>
    %2 = tpu.matmul %0, %1, %cst {dimension_numbers = #tpu.dot_dimension_numbers<[1], [1], [0], [0], [0, 0, 1, 0], [], []>} : vector<8x16xf32>, vector<32x16xf32>, vector<8x32xf32> -> vector<8x32xf32>
    %c0_3 = arith.constant 0 : index
    %c0_4 = arith.constant 0 : index
    %3 = vector.load %arg3[%c0_3, %c0_4] : memref<1x32xf32, #tpu.memory_space<vmem>>, vector<1x32xf32>
    %4 = vector.broadcast %3 : vector<1x32xf32> to vector<8x32xf32>
    %5 = arith.addf %2, %4 : vector<8x32xf32>
    %cst_5 = arith.constant 0.000000e+00 : f32
    %6 = vector.broadcast %cst_5 : f32 to vector<8x32xf32>
    %7 = arith.maximumf %5, %6 : vector<8x32xf32>
    %c0_6 = arith.constant 0 : index
    %c0_7 = arith.constant 0 : index
    %8 = vector.load %arg4[%c0_6, %c0_7] : memref<32x32xf32, #tpu.memory_space<vmem>>, vector<32x32xf32>
    %cst_8 = arith.constant dense<0.000000e+00> : vector<8x32xf32>
    %9 = tpu.matmul %7, %8, %cst_8 {dimension_numbers = #tpu.dot_dimension_numbers<[1], [1], [0], [0], [0, 0, 1, 0], [], []>} : vector<8x32xf32>, vector<32x32xf32>, vector<8x32xf32> -> vector<8x32xf32>
    %c0_9 = arith.constant 0 : index
    %c0_10 = arith.constant 0 : index
    %10 = vector.load %arg5[%c0_9, %c0_10] : memref<1x32xf32, #tpu.memory_space<vmem>>, vector<1x32xf32>
    %11 = vector.broadcast %10 : vector<1x32xf32> to vector<8x32xf32>
    %12 = arith.addf %9, %11 : vector<8x32xf32>
    %cst_11 = arith.constant 0.000000e+00 : f32
    %13 = vector.broadcast %cst_11 : f32 to vector<8x32xf32>
    %14 = arith.maximumf %12, %13 : vector<8x32xf32>
    %c0_12 = arith.constant 0 : index
    %c0_13 = arith.constant 0 : index
    %15 = vector.load %arg6[%c0_12, %c0_13] : memref<8x32xf32, #tpu.memory_space<vmem>>, vector<8x32xf32>
    %cst_14 = arith.constant dense<0.000000e+00> : vector<8x8xf32>
    %16 = tpu.matmul %14, %15, %cst_14 {dimension_numbers = #tpu.dot_dimension_numbers<[1], [1], [0], [0], [0, 0, 1, 0], [], []>} : vector<8x32xf32>, vector<8x32xf32>, vector<8x8xf32> -> vector<8x8xf32>
    %c0_15 = arith.constant 0 : index
    %c0_16 = arith.constant 0 : index
    %17 = vector.load %arg7[%c0_15, %c0_16] : memref<1x8xf32, #tpu.memory_space<vmem>>, vector<1x8xf32>
    %18 = vector.broadcast %17 : vector<1x8xf32> to vector<8x8xf32>
    %19 = arith.addf %16, %18 : vector<8x8xf32>
    %c0_17 = arith.constant 0 : index
    %c0_18 = arith.constant 0 : index
    %20 = vector.load %arg8[%c0_17, %c0_18] : memref<8x8xf32, #tpu.memory_space<vmem>>, vector<8x8xf32>
    tpu.vector_store %arg8[%c0_17, %c0_18], %19 {strides = array<i32>} : memref<8x8xf32, #tpu.memory_space<vmem>>, vector<8x8xf32>,
    return
  }
  func.func @transform_0(%arg0: i32) -> (i32, i32) {
    %c0_i32 = arith.constant 0 : i32
    %c0_i32_0 = arith.constant 0 : i32
    return %arg0, %c0_i32 : i32, i32
  }
  func.func @transform_1(%arg0: i32) -> (i32, i32) {
    %c0_i32 = arith.constant 0 : i32
    %c0_i32_0 = arith.constant 0 : i32
    %c0_i32_1 = arith.constant 0 : i32
    return %c0_i32, %c0_i32_0 : i32, i32
  }
  func.func @transform_2(%arg0: i32) -> (i32, i32) {
    %c0_i32 = arith.constant 0 : i32
    %c0_i32_0 = arith.constant 0 : i32
    %c0_i32_1 = arith.constant 0 : i32
    return %c0_i32, %c0_i32_0 : i32, i32
  }
  func.func @transform_3(%arg0: i32) -> (i32, i32) {
    %c0_i32 = arith.constant 0 : i32
    %c0_i32_0 = arith.constant 0 : i32
    %c0_i32_1 = arith.constant 0 : i32
    return %c0_i32, %c0_i32_0 : i32, i32
  }
  func.func @transform_4(%arg0: i32) -> (i32, i32) {
    %c0_i32 = arith.constant 0 : i32
    %c0_i32_0 = arith.constant 0 : i32
    %c0_i32_1 = arith.constant 0 : i32
    return %c0_i32, %c0_i32_0 : i32, i32
  }
  func.func @transform_5(%arg0: i32) -> (i32, i32) {
    %c0_i32 = arith.constant 0 : i32
    %c0_i32_0 = arith.constant 0 : i32
    %c0_i32_1 = arith.constant 0 : i32
    return %c0_i32, %c0_i32_0 : i32, i32
  }
  func.func @transform_6(%arg0: i32) -> (i32, i32) {
    %c0_i32 = arith.constant 0 : i32
    %c0_i32_0 = arith.constant 0 : i32
    %c0_i32_1 = arith.constant 0 : i32
    return %c0_i32, %c0_i32_0 : i32, i32
  }
  func.func @transform_7(%arg0: i32) -> (i32, i32) {
    %c0_i32 = arith.constant 0 : i32
    %c0_i32_0 = arith.constant 0 : i32
    return %arg0, %c0_i32 : i32, i32
  }
}

</mosaic_0001>

<bundles_post_ra>
// kernel: tpu_custom_call.1
= control target key start
LH: loop header
LB: loop body
LE: loop exit
PB: predicated region body
PF: predicated region fallthrough
CT: control target
= control target key end

     0   :  { %vm39_vm0 = vcmask 130048   ;;  %v403_v1 = vmov 0.0   ;;  %vm404_vm1 = vmmov 0   ;;  %vm137_vm2 = vcmask 261120   ;;  %s503_s0 = inlined_call_operand.vmem [shape: f32[8,16], index: 0, kind: input, shape index: {}]   ;;  %s504_s1 = inlined_call_operand.vmem [shape: f32[32,16], index: 1, kind: input, shape index: {}]   ;;  %s505_s2 = inlined_call_operand.vmem [shape: f32[1,32], index: 2, kind: input, shape index: {}]   ;;  %s506_s3 = inlined_call_operand.vmem [shape: f32[32,32], index: 3, kind: input, shape index: {}]   ;;  %s507_s4 = inlined_call_operand.vmem [shape: f32[1,32], index: 4, kind: input, shape index: {}]   ;;  %s508_s5 = inlined_call_operand.vmem [shape: f32[8,32], index: 5, kind: input, shape index: {}]   ;;  %s509_s6 = inlined_call_operand.vmem [shape: f32[1,8], index: 6, kind: input, shape index: {}]   ;;  %s510_s7 = inlined_call_operand.hbm [shape: f32[8,8], index: 7, kind: output, shape index: {}]  }
   0x1   :  { %v31_v0 = vld [vmem:[%s504_s1 + $0x18] sm:$0xff]  ;;  %351 = vmatprep.subr.mxu0 %v403_v1  ;;  %359 = vmatprep.mubr.msk.f32.mxu0 %vm404_vm1, %v403_v1  ;;  %v30_v3 = vld [vmem:[%s504_s1 + $0x10] sm:$0xff] }
   0x2   :  { %v129_v2 = vld [vmem:[%s506_s3 + $0x18] sm:$0xff]  ;;  %352 = vmatpush3.xpose.msk.msra.mxu0 %vm39_vm0, %v31_v0  ;;  %362 = vmatprep.subr.mxu1 %v403_v1 }
   0x3   :  { %353 = vmatprep.subr.mxu0 %v403_v1  ;;  %363 = vmatpush3.xpose.msk.msra.mxu1 %vm137_vm2, %v129_v2 }
   0x4   :  { %12 = vsyncpa [#allocation3], 0  ;;  %364 = vmatprep.subr.mxu1 %v403_v1  ;;  %v128_v4 = vld [vmem:[%s506_s3 + $0x10] sm:$0xff]  ;;  %370 = vmatprep.mubr.msk.f32.mxu1 %vm404_vm1, %v403_v1  ;;  %v29_v5 = vld [vmem:[%s504_s1 + $0x8] sm:$0xff]  ;;  %s405_s23 = smov [#allocation2]   ;;  %vm308_vm3 = vcmask 64512  }
   0x5   :  { %v127_v6 = vld [vmem:[%s506_s3 + $0x8] sm:$0xff]  ;;  %v28_v7 = vld [vmem:[%s504_s1] sm:$0xff]  ;;  %s316_s24 = sshll.u32 %s405_s23, 4  ;;  %s317_s24 = int_to_ptr.vmem [resolvable:$true] %s316_s24 }
   0x6   :  { %354 = vmatpush3.xpose.msk.msra.mxu0 %vm39_vm0, %v30_v3  ;;  %v27_v8 = vld [vmem:[%s503_s0] sm:$0xff]  ;;  %p386_p1 = scmp.lt.s32.totalorder %s317_s24, %s317_s24 }
   0x7   :  { %355 = vmatprep.subr.mxu0 %v403_v1  ;;  %365 = vmatpush3.xpose.msk.msra.mxu1 %vm137_vm2, %v128_v4  ;;  %v126_v9 = vld [vmem:[%s506_s3] sm:$0xff] }
   0x8   :  { %366 = vmatprep.subr.mxu1 %v403_v1  ;;  %v324_v10 = vld [vmem:[%s505_s2] ss:$0 sm:$0xff] }
   0x9   :  { %v224_v15 = vld [vmem:[%s508_s5] sm:$0xff]  ;;  %s381_s5 = scalar_lea.vmem %s317_s24, 128 }
   0xa   :  { %356 = vmatpush3.xpose.msk.msra.mxu0 %vm39_vm0, %v29_v5  ;;  %v330_v16 = vld [vmem:[%s507_s4] ss:$0 sm:$0xff]  ;;  %p382_p0 = scmp.ne.s32.totalorder %s317_s24, %s381_s5  ;;  %p387_p2 = scmp.lt.s32.totalorder %s381_s5, %s381_s5 }
   0xb   :  { %357 = vmatprep.subr.mxu0 %v403_v1  ;;  %367 = vmatpush3.xpose.msk.msra.mxu1 %vm137_vm2, %v127_v6  ;;  %v336_v21 = vld [vmem:[%s509_s6] ss:$0 sm:$0xff] }
   0xc   :  { %368 = vmatprep.subr.mxu1 %v403_v1  ;;  %p388_p3 = por %p387_p2, %p386_p1 }
   0xe   :  { %358 = vmatpush3.xpose.msk.msra.mxu0 %vm39_vm0, %v28_v7  ;;  %p389_p4 = pnand %p388_p3, %p382_p0 }
   0xf   :  { %373 = vmatprep.subr.mxu0 %v403_v1  ;;  %369 = vmatpush3.xpose.msk.msra.mxu1 %vm137_vm2, %v126_v9 }
  0x11   :  { %360 = vmatmul.mubr.msk.f32.vlgmr.msra.gmra.mxu0 %vm39_vm0, %v27_v8 }
  0x12   :  { %375 = vmatprep.mubr.msk.f32.mxu0 %vm404_vm1, %v403_v1  ;;  %374 = vmatpush3.xpose.msk.msra.mxu0 %vm137_vm2, %v224_v15 }
  0xd1   :  { %v121_v11 = vpop.f32.mrf.mxu0 }
  0xd2   :  { %v122_v12 = vadd.f32 %v324_v10, %v121_v11 }
  0xd3   :  { %v361_v13 = vpop.f32.mrf.mxu0 }
  0xd4   :  { %v125_v14 = vmax.f32 %v122_v12, 0.0 }
  0xd6   :  { %371 = vmatmul.mubr.msk.f32.vlgmr.msra.gmra.mxu1 %vm137_vm2, %v125_v14 }
 0x196   :  { %v219_v17 = vpop.f32.mrf.mxu1 }
 0x197   :  { %v220_v18 = vadd.f32 %v330_v16, %v219_v17 }
 0x198   :  { %v372_v19 = vpop.f32.mrf.mxu1 }
 0x199   :  { %v223_v20 = vmax.f32 %v220_v18, 0.0 }
 0x19b   :  { %376 = vmatmul.mubr.msk.f32.vlgmr.msra.gmra.mxu0 %vm137_vm2, %v223_v20 }
 0x25b   :  { %v304_v22 = vpop.f32.mrf.mxu0 }
 0x25c   :  { %v305_v23 = vadd.f32 %v336_v21, %v304_v22 }
 0x25d   :  { %v377_v24 = vpop.f32.mrf.mxu0 }
 0x25e   :  { %309 = vst.msk [vmem:[#allocation2] sm:$0xff] %vm308_vm3, %v305_v23 }
 0x25f   :  { %392 = shalt.err (!%p389_p4)
}
 0x260   :  { %319 = dma.vmem_to_hbm [thread:$0]  %s317_s24, 128, %s510_s7, [#allocation3]  }
 0x261   :  { %401 = dma.done.wait [#allocation3], 128  }
 0x262   :  { %402 = vsyncadd [#allocation3], 4294967168 }
 0x263   :  { %323 = vsyncpa [#allocation3], 1 }

</bundles_post_ra>
